<compile_context>
chip_gen: v5e
topology: v5e:2x2
jax: 0.10.0
libtpu: 0.0.40
codegen_flags: <defaults>
</compile_context>

<pallas_src>
import functools
import math

import numpy as np

import jax
import jax.numpy as jnp
from jax.experimental import pallas as pl
from jax.experimental.pallas import tpu as pltpu


def make_pos_embedding(emb_size: int, maxlen: int = 5000) -> jnp.ndarray:
    """Deterministic buffer, identical to the PyTorch __init__ math."""
    den = jnp.exp(-jnp.arange(0, emb_size, 2, dtype=jnp.float32)
                  * (math.log(10000.0) / emb_size))
    pos = jnp.arange(0, maxlen, dtype=jnp.float32).reshape(maxlen, 1)
    pe = jnp.zeros((maxlen, emb_size), dtype=jnp.float32)
    pe = pe.at[:, 0::2].set(jnp.sin(pos * den))
    pe = pe.at[:, 1::2].set(jnp.cos(pos * den))
    return pe[:, None, :]  # (maxlen, 1, emb_size)


@functools.lru_cache(maxsize=None)
def _hw_prng_available() -> bool:
    """True iff pltpu.prng_seed / prng_random_bits lower & run on the current
    backend (real TPU). Under CPU / interpret modes without a PRNG lowering we
    fall back to a counter-based hash (same semantics, slower)."""
    def probe(o_ref):
        pltpu.prng_seed(0)
        o_ref[...] = pltpu.prng_random_bits(o_ref.shape).astype(jnp.float32)

    try:
        out = pl.pallas_call(
            probe, out_shape=jax.ShapeDtypeStruct((8, 128), jnp.float32))()
        jax.block_until_ready(out)
        return True
    except Exception:
        return False


def _make_kernel(dropout_p: float, train: bool, use_hw_prng: bool):
    apply_dropout = train and dropout_p > 0.0
    # Plain Python scalars only (jax.Array constants captured by the kernel
    # are rejected by pallas_call).
    inv_keep = 1.0 / (1.0 - dropout_p) if dropout_p < 1.0 else 0.0
    # drop iff bits < thresh (uint32 compare)  =>  P(drop) = dropout_p
    thresh = min(int(round(dropout_p * 4294967296.0)), 4294967295)

    def kernel(seed_ref, x_ref, pe_ref, o_ref):
        # Add in the input dtype (bf16-native on v6e/v7x, no f32 upcast).
        # pe broadcasts over the batch axis in the 3-D layout and matches
        # exactly in the folded 2-D layout.
        y = x_ref[...] + pe_ref[...]
        if apply_dropout:
            shape = y.shape
            rows = 1
            for d in shape[:-1]:
                rows *= d
            last = shape[-1]
            if use_hw_prng:
                # Hardware PRNG: reseed per grid step so the mask is
                # deterministic for a given (seed, tiling) and tiles are
                # independent under megacore sharding.
                pltpu.prng_seed(seed_ref[0] + pl.program_id(0) * 7919)
                bits = pltpu.prng_random_bits((rows, last))
                if bits.dtype != jnp.uint32:
                    bits = pltpu.bitcast(bits, jnp.uint32)
            else:
                # Fallback (interpret mode / non-TPU): counter-based lowbias32
                # hash of the global element index; uint32 arithmetic so very
                # large tensors wrap instead of hitting signed overflow.
                pid = pl.program_id(0).astype(jnp.uint32)
                r = jax.lax.broadcasted_iota(jnp.int32, (rows, last), 0
                                             ).astype(jnp.uint32)
                c = jax.lax.broadcasted_iota(jnp.int32, (rows, last), 1
                                             ).astype(jnp.uint32)
                ctr = pid * np.uint32(rows * last) + r * np.uint32(last) + c
                h = ctr + seed_ref[0].astype(jnp.uint32) * np.uint32(0x9E3779B1)
                h = h ^ (h >> 16)
                h = h * np.uint32(0x7FEB352D)
                h = h ^ (h >> 15)
                h = h * np.uint32(0x846CA68B)
                h = h ^ (h >> 16)
                bits = h
            bits = bits.reshape(shape)
            keep = bits >= np.uint32(thresh)
            y = jnp.where(keep, y * inv_keep, 0.0)
        o_ref[...] = y.astype(o_ref.dtype)

    return kernel


def _pick_tile_s(S: int, row_bytes: int, sublane_aligned: bool,
                 tile_bytes: int = 3 * 1024 * 1024) -> int:
    """Rows of S per tile, sized purely in bytes (~3 MiB per x tile keeps the
    double-buffered in/out tiles plus dropout temporaries well inside a 32 MiB
    scoped-VMEM budget on v5e/v6e/v7x while staying in the >=85%-of-roofline
    tile regime). If everything fits one tile but S >= 16, split in two so
    both v7x TensorCores get a grid step."""
    ts = max(1, tile_bytes // max(1, row_bytes))
    if ts >= S and S >= 16:
        ts = (S + 1) // 2
    if ts >= S:
        return S
    if sublane_aligned:  # folded 2-D blocks: sublane dim must be % 8 (or == S)
        ts = max(8, (ts // 8) * 8)
    return min(ts, S)


def positional_encoding(token_embedding: jnp.ndarray,
                        pos_embedding: jnp.ndarray,
                        dropout_p: float,
                        seed: int,
                        train: bool = True) -> jnp.ndarray:
    """token_embedding: (S, N, E); pos_embedding: (maxlen, 1, E) float32."""
    S, N, E = token_embedding.shape
    maxlen = pos_embedding.shape[0]
    assert S <= maxlen, f"sequence length {S} exceeds pos_embedding maxlen {maxlen}"

    dropout_p = float(dropout_p)
    apply_dropout = bool(train) and dropout_p > 0.0
    if apply_dropout and dropout_p >= 1.0:
        return jnp.zeros_like(token_embedding)

    x_dtype = token_embedding.dtype
    itemsize = jnp.dtype(x_dtype).itemsize
    # TODO(synk): PyTorch promotes bf16 input + f32 buffer to f32 output; we
    # keep the input dtype (bf16-native compute per the v6e/v7x perf review).
    pe = pos_embedding[:S].astype(x_dtype)              # static slice, (S, 1, E)

    seed_arr = jnp.array([int(seed) & 0x7FFFFFFF], dtype=jnp.int32)
    use_hw_prng = apply_dropout and _hw_prng_available()
    kernel = _make_kernel(dropout_p, bool(train), use_hw_prng)

    fold = (E % 128 != 0) and ((N * E) % 128 == 0)
    row_bytes = N * E * itemsize
    ts = _pick_tile_s(S, row_bytes, sublane_aligned=fold)
    grid = (pl.cdiv(S, ts),)
    cparams = pltpu.CompilerParams(
        dimension_semantics=("parallel",),   # independent S tiles -> 2-TC on v7x
        vmem_limit_bytes=32 * 1024 * 1024)

    if fold:
        # Lane-dense path: fold (N, E) into the lane dimension so the output
        # store is an unmasked 128-lane vst (biggest store-path lever when E<128).
        NE = N * E
        x2 = token_embedding.reshape(S, NE)
        pe2 = jnp.broadcast_to(pe, (S, N, E)).reshape(S, NE)   # pre-tiled pe rows
        grid_spec = pltpu.PrefetchScalarGridSpec(
            num_scalar_prefetch=1,           # seed lands in SMEM
            grid=grid,
            in_specs=[pl.BlockSpec((ts, NE), lambda i, seed: (i, 0)),
                      pl.BlockSpec((ts, NE), lambda i, seed: (i, 0))],
            out_specs=pl.BlockSpec((ts, NE), lambda i, seed: (i, 0)))
        out = pl.pallas_call(
            kernel,
            out_shape=jax.ShapeDtypeStruct((S, NE), x_dtype),
            grid_spec=grid_spec,
            compiler_params=cparams,
        )(seed_arr, x2, pe2)
        return out.reshape(S, N, E)

    # TODO(synk): when E % 128 != 0 and (N*E) % 128 != 0 (toy sizes) the output
    # store is still a masked partial vst; production E (multiple of 128) is
    # already lane-dense on this path.
    grid_spec = pltpu.PrefetchScalarGridSpec(
        num_scalar_prefetch=1,
        grid=grid,
        in_specs=[pl.BlockSpec((ts, N, E), lambda i, seed: (i, 0, 0)),
                  pl.BlockSpec((ts, 1, E), lambda i, seed: (i, 0, 0))],
        out_specs=pl.BlockSpec((ts, N, E), lambda i, seed: (i, 0, 0)))
    return pl.pallas_call(
        kernel,
        out_shape=jax.ShapeDtypeStruct((S, N, E), x_dtype),
        grid_spec=grid_spec,
        compiler_params=cparams,
    )(seed_arr, token_embedding, pe)


if __name__ == "__main__":
    MAXLEN = 64
    DROPOUT_P = 0.1

    # ---- Case A: (S, N, E) = (8, 4, 32) -> N*E = 128: lane-dense folded path.
    S, N, E = 8, 4, 32
    pos_emb = make_pos_embedding(E, MAXLEN)                       # (64, 1, 32) f32
    x = jax.random.normal(jax.random.PRNGKey(0), (S, N, E), dtype=jnp.float32)
    ref = x + pos_emb[:S]

    out_eval = jax.block_until_ready(
        positional_encoding(x, pos_emb, DROPOUT_P, seed=0, train=False))
    assert out_eval.shape == (S, N, E)
    assert jnp.allclose(out_eval, ref, atol=1e-6), "eval-mode mismatch (folded path)"

    out_train = jax.block_until_ready(
        positional_encoding(x, pos_emb, DROPOUT_P, seed=1234, train=True))
    scaled = ref * (1.0 / (1.0 - DROPOUT_P))
    dropped = jnp.isclose(out_train, 0.0, atol=1e-6)
    kept = jnp.isclose(out_train, scaled, rtol=1e-5, atol=1e-6)
    assert bool(jnp.all(dropped | kept)), "train-mode mismatch (folded path)"
    frac = float(jnp.mean(dropped.astype(jnp.float32)))
    assert 0.01 <= frac <= 0.30, f"implausible dropout fraction {frac} for p=0.1"

    # ---- Case B: (S, N, E) = (8, 2, 32) -> N*E = 64: 3-D (non-folded) path.
    S2, N2 = 8, 2
    x2 = jax.random.normal(jax.random.PRNGKey(1), (S2, N2, E), dtype=jnp.float32)
    ref2 = x2 + pos_emb[:S2]

    out_eval2 = jax.block_until_ready(
        positional_encoding(x2, pos_emb, DROPOUT_P, seed=0, train=False))
    assert jnp.allclose(out_eval2, ref2, atol=1e-6), "eval-mode mismatch (3-D path)"

    out_train2 = jax.block_until_ready(
        positional_encoding(x2, pos_emb, DROPOUT_P, seed=7, train=True))
    scaled2 = ref2 * (1.0 / (1.0 - DROPOUT_P))
    ok2 = (jnp.isclose(out_train2, 0.0, atol=1e-6)
           | jnp.isclose(out_train2, scaled2, rtol=1e-5, atol=1e-6))
    assert bool(jnp.all(ok2)), "train-mode mismatch (3-D path)"

    # ---- bf16 input: compute stays bf16-native (v6e/v7x perf-review item).
    xb = x.astype(jnp.bfloat16)
    out_bf16 = jax.block_until_ready(
        positional_encoding(xb, pos_emb, DROPOUT_P, seed=0, train=False))
    ref_bf16 = xb + pos_emb[:S].astype(jnp.bfloat16)
    assert out_bf16.dtype == jnp.bfloat16
    assert jnp.allclose(out_bf16.astype(jnp.float32), ref_bf16.astype(jnp.float32),
                        atol=0.05, rtol=0.05), "eval-mode mismatch (bf16 path)"

    print("KERNEL_OK")
</pallas_src>

<mosaic_0001>
module attributes {stable_mosaic.version = 11 : i64} {
  func.func @kernel(%arg0: i32, %arg1: memref<1xi32, #tpu.memory_space<smem>>, %arg2: memref<8x128xf32, #tpu.memory_space<vmem>>, %arg3: memref<8x128xf32, #tpu.memory_space<vmem>>, %arg4: memref<8x128xf32, #tpu.memory_space<vmem>>) attributes {dimension_semantics = [#tpu.dimension_semantics<parallel>], iteration_bounds = array<i64: 1>, scalar_prefetch = 1 : i64, scratch_operands = 0 : i64, tpu.core_type = #tpu.core_type<tc>, window_params = [{transform_indices = @transform_0, window_bounds = array<i64: 8, 128>}, {transform_indices = @transform_1, window_bounds = array<i64: 8, 128>}, {transform_indices = @transform_2, window_bounds = array<i64: 8, 128>}]} {
    %c0 = arith.constant 0 : index
    %c0_0 = arith.constant 0 : index
    %0 = vector.load %arg2[%c0, %c0_0] : memref<8x128xf32, #tpu.memory_space<vmem>>, vector<8x128xf32>
    %c0_1 = arith.constant 0 : index
    %c0_2 = arith.constant 0 : index
    %1 = vector.load %arg3[%c0_1, %c0_2] : memref<8x128xf32, #tpu.memory_space<vmem>>, vector<8x128xf32>
    %2 = arith.addf %0, %1 : vector<8x128xf32>
    %c0_3 = arith.constant 0 : index
    %c0_4 = arith.constant 0 : index
    %3 = vector.load %arg4[%c0_3, %c0_4] : memref<8x128xf32, #tpu.memory_space<vmem>>, vector<8x128xf32>
    tpu.vector_store %arg4[%c0_3, %c0_4], %2 {strides = array<i32>} : memref<8x128xf32, #tpu.memory_space<vmem>>, vector<8x128xf32>,
    return
  }
  func.func @transform_0(%arg0: i32, %arg1: memref<1xi32, #tpu.memory_space<smem>>) -> (i32, i32) {
    %c0_i32 = arith.constant 0 : i32
    %c0_i32_0 = arith.constant 0 : i32
    return %arg0, %c0_i32 : i32, i32
  }
  func.func @transform_1(%arg0: i32, %arg1: memref<1xi32, #tpu.memory_space<smem>>) -> (i32, i32) {
    %c0_i32 = arith.constant 0 : i32
    %c0_i32_0 = arith.constant 0 : i32
    return %arg0, %c0_i32 : i32, i32
  }
  func.func @transform_2(%arg0: i32, %arg1: memref<1xi32, #tpu.memory_space<smem>>) -> (i32, i32) {
    %c0_i32 = arith.constant 0 : i32
    %c0_i32_0 = arith.constant 0 : i32
    return %arg0, %c0_i32 : i32, i32
  }
}

</mosaic_0001>

<bundles_post_ra>
// kernel: tpu_custom_call.1
= control target key start
LH: loop header
LB: loop body
LE: loop exit
PB: predicated region body
PF: predicated region fallthrough
CT: control target
= control target key end

     0   :  { %9 = vsyncpa [#allocation5], 0  ;;  %s177_s0 = inlined_call_operand.<no memory space> [shape: s32[1], index: 0, kind: input, shape index: {}]   ;;  %s178_s1 = inlined_call_operand.hbm [shape: f32[8,128], index: 1, kind: input, shape index: {}]   ;;  %s179_s2 = inlined_call_operand.hbm [shape: f32[8,128], index: 2, kind: input, shape index: {}]   ;;  %s180_s3 = inlined_call_operand.hbm [shape: f32[8,128], index: 3, kind: output, shape index: {}]  }
   0x1   :  { %10 = vsyncpa [#allocation8], 0 }
   0x2   :  { %11 = vsyncpa [#allocation6], 0  ;;  %s17_s14 = sshll.u32 %s178_s1, 4  ;;  %s145_s15 = smov [#allocation4]   ;;  %s18_s14 = int_to_ptr.hbm [resolvable:$true] %s17_s14 }
   0x3   :  { %s19_s16 = sshll.u32 %s145_s15, 4  ;;  %s28_s18 = sshll.u32 %s179_s2, 4  ;;  %s20_s16 = int_to_ptr.vmem [resolvable:$true] %s19_s16  ;;  %s29_s18 = int_to_ptr.hbm [resolvable:$true] %s28_s18 }
   0x4   :  { %22 = dma.hbm_to_vmem [thread:$0]  %s18_s14, 128, %s20_s16, [#allocation5]  }
   0x5   :  { %s146_s19 = smov [#allocation7]  }
   0x6   :  { %s30_s20 = sshll.u32 %s146_s19, 4  ;;  %s31_s20 = int_to_ptr.vmem [resolvable:$true] %s30_s20 }
   0x7   :  { %33 = dma.hbm_to_vmem [thread:$0]  %s29_s18, 128, %s31_s20, [#allocation8]  }
   0x8   :  { %139 = dma.done.wait [#allocation5], 128  }
   0x9   :  { %140 = vsyncadd [#allocation5], 4294967168 }
   0xa   :  { %141 = dma.done.wait [#allocation8], 128  }
   0xb   :  { %142 = vsyncadd [#allocation8], 4294967168  ;;  %s147_s21 = smov [#allocation9]   ;;  %s53_s24 = sshll.u32 %s180_s3, 4  ;;  %v42_v0 = vld [vmem:[#allocation4] sm:$0xff]  ;;  %v43_v1 = vld [vmem:[#allocation7] sm:$0xff]  ;;  %s54_s24 = int_to_ptr.hbm [resolvable:$true] %s53_s24 }
   0xc   :  { %s51_s1 = sshll.u32 %s147_s21, 4  ;;  %v44_v2 = vadd.f32 %v43_v1, %v42_v0  ;;  %s52_s1 = int_to_ptr.vmem [resolvable:$true] %s51_s1 }
   0xe   :  { %45 = vst [vmem:[#allocation9] sm:$0xff] %v44_v2 }
   0xf   :  { %56 = dma.vmem_to_hbm [thread:$0]  %s52_s1, 128, %s54_s24, [#allocation6]  }
  0x10   :  { %143 = dma.done.wait [#allocation6], 128  }
  0x11   :  { %144 = vsyncadd [#allocation6], 4294967168 }
  0x12   :  { %61 = vsyncpa [#allocation5], 1 }
  0x13   :  { %62 = vsyncpa [#allocation8], 1 }
  0x14   :  { %63 = vsyncpa [#allocation6], 1 }

</bundles_post_ra>
